<compile_context>
chip_gen: v7x
topology: tpu7x:2x2x1
jax: 0.10.0
libtpu: 0.0.40
codegen_flags: <defaults>
</compile_context>

<pallas_src>
import math

import jax
import jax.numpy as jnp
from jax.experimental import pallas as pl
from jax.experimental.pallas import tpu as pltpu


def _round_up(v, m):
    return ((v + m - 1) // m) * m


def _choose_tb(B, batch_block):
    """Pick (TB, n_blocks): TB multiple of 8 (sublane-legal when n_blocks > 1),
    as large as possible up to batch_block, and >= 2 grid steps when the batch
    is big enough so v7x's dual TensorCores both get work."""
    if B <= 8:
        return B, 1                                   # single block == full dims
    tb = _round_up(min(batch_block, _round_up(B, 8)), 8)
    n = pl.cdiv(B, tb)
    if n == 1 and B > 16:
        tb = _round_up(pl.cdiv(B, 2), 8)              # split for dual-TC chips
        n = pl.cdiv(B, tb)
    return tb, n


def graph_encoder_kernel(x_ref, k1_ref, b1_ref, k2_ref, b2_ref,
                         wh_ref, bh_ref, out_ref):
    bf = jnp.bfloat16
    # conv1 (att1 kron-fused into K1):  relu(x_flat @ K1 + b1_tiled)
    x = x_ref[...].astype(bf)                                        # (TB, C*N)
    y1 = jnp.dot(x, k1_ref[...],
                 preferred_element_type=jnp.float32) + b1_ref[...]   # (TB, N*H) f32
    y1 = jnp.maximum(y1, 0.0)
    # conv2 (att2 kron-fused into K2):  relu(y1 @ K2 + b2_tiled)
    y2 = jnp.dot(y1.astype(bf), k2_ref[...],
                 preferred_element_type=jnp.float32) + b2_ref[...]   # (TB, N*H) f32
    y2 = jnp.maximum(y2, 0.0)
    # node-sum + mlp + mean/log_var heads folded into one lane-dense matmul:
    # out = [x_latent | mean | log_var | 0-pad-to-128]
    out_ref[...] = jnp.dot(y2.astype(bf), wh_ref[...],
                           preferred_element_type=jnp.float32) + bh_ref[...]
    # TODO(synk): reparameterization_trick(mean, log_var) is undefined in the
    # source and its result `z` is discarded (not returned), so it is omitted.


def prepare_encoder_weights(params, num_nodes, input_size, hidden_size,
                            latent_size):
    """One-time weight preparation (hoisted out of the per-call path)."""
    N, C, H, L = num_nodes, input_size, hidden_size, latent_size
    bf = jnp.bfloat16

    # conv1, consuming x in native (B, C, N) layout flattened to (B, C*N):
    #   K1[c*N + m, n*H + h] = att1[n, m] * W1[c, h]
    k1 = jnp.einsum("nm,ch->cmnh", params["att1"], params["w1"]).reshape(C * N, N * H)
    # conv2:  K2[m*H + g, n*H + h] = att2[n, m] * W2[g, h]   (= kron(att2^T, W2))
    k2 = jnp.einsum("nm,gh->mgnh", params["att2"], params["w2"]).reshape(N * H, N * H)
    b1t = jnp.tile(params["b1"].reshape(1, H), (1, N))                # (1, N*H)
    b2t = jnp.tile(params["b2"].reshape(1, H), (1, N))                # (1, N*H)

    # Fused head: node-sum + mlp + mean/var, zero-padded to a 128-lane multiple.
    # Folding W_mlp directly avoids the extra bf16 rounding of x_latent that the
    # previous identity-block trick introduced.
    w_mlp_rep = jnp.tile(params["w_mlp"], (N, 1))                     # (N*H, L)
    b_mlp = params["b_mlp"].reshape(1, L)
    out_w = _round_up(3 * L, 128)
    w_head = jnp.zeros((N * H, out_w), jnp.float32)
    w_head = w_head.at[:, 0:L].set(w_mlp_rep)
    w_head = w_head.at[:, L:2 * L].set(w_mlp_rep @ params["w_mean"])
    w_head = w_head.at[:, 2 * L:3 * L].set(w_mlp_rep @ params["w_var"])
    b_head = jnp.zeros((1, out_w), jnp.float32)
    b_head = b_head.at[:, 0:L].set(b_mlp)
    b_head = b_head.at[:, L:2 * L].set(b_mlp @ params["w_mean"] + params["b_mean"].reshape(1, L))
    b_head = b_head.at[:, 2 * L:3 * L].set(b_mlp @ params["w_var"] + params["b_var"].reshape(1, L))

    return {
        "k1": k1.astype(bf), "b1": b1t.astype(jnp.float32),
        "k2": k2.astype(bf), "b2": b2t.astype(jnp.float32),
        "w_head": w_head.astype(bf), "b_head": b_head,
        "latent_size": L,
    }


def graph_encoder_forward(x, prep, *, batch_block=256):
    """x: (B, input_size, num_nodes) f32 -> (x_latent, mean, log_var), each (B, L)."""
    B, C, N = x.shape
    NC = C * N
    NH = prep["k2"].shape[0]
    out_w = prep["w_head"].shape[1]
    L = prep["latent_size"]

    xf = x.reshape(B, NC)                      # free view; native (B, C, N) layout
    TB, n_blocks = _choose_tb(B, batch_block)
    Bp = TB * n_blocks
    if Bp != B:
        xf = jnp.pad(xf, ((0, Bp - B), (0, 0)))

    weights = (prep["k1"], prep["b1"], prep["k2"], prep["b2"],
               prep["w_head"], prep["b_head"])

    flops = 2 * Bp * (NC * NH + NH * NH + NH * out_w)
    bytes_accessed = (xf.size * xf.dtype.itemsize
                      + sum(int(w.size) * w.dtype.itemsize for w in weights)
                      + Bp * out_w * 4)

    # TODO(synk): at large H/N, single-buffer the resident weight specs
    # (pipeline_mode=pl.Buffered(1)) and set vmem_limit_bytes against v7x's
    # 64 MiB before shrinking TB; irrelevant at these sizes (<1 MiB resident).
    out = pl.pallas_call(
        graph_encoder_kernel,
        grid=(n_blocks,),
        in_specs=[pl.BlockSpec((TB, NC), lambda i: (i, 0))]
                 + [pl.BlockSpec(w.shape, lambda i: (0, 0)) for w in weights],
        out_specs=pl.BlockSpec((TB, out_w), lambda i: (i, 0)),
        out_shape=jax.ShapeDtypeStruct((Bp, out_w), jnp.float32),
        compiler_params=pltpu.CompilerParams(dimension_semantics=("parallel",)),
        cost_estimate=pl.CostEstimate(flops=flops, transcendentals=0,
                                      bytes_accessed=bytes_accessed),
    )(xf, *weights)

    out = out[:B]
    return out[:, 0:L], out[:, L:2 * L], out[:, 2 * L:3 * L]


def init_params(key, num_nodes, input_size, hidden_size, latent_size):
    ks = jax.random.split(key, 12)

    def u(k, shape, bound):
        return jax.random.uniform(k, shape, jnp.float32, -bound, bound)

    s_gc = 1.0 / math.sqrt(hidden_size)    # GraphConvolution: 1/sqrt(out_features)
    s_mlp = 1.0 / math.sqrt(hidden_size)   # nn.Linear: 1/sqrt(in_features)
    s_head = 1.0 / math.sqrt(latent_size)

    return {
        "w1":     u(ks[0], (input_size, hidden_size), s_gc),
        "att1":   u(ks[1], (num_nodes, num_nodes), s_gc),
        "b1":     u(ks[2], (hidden_size,), s_gc),
        "w2":     u(ks[3], (hidden_size, hidden_size), s_gc),
        "att2":   u(ks[4], (num_nodes, num_nodes), s_gc),
        "b2":     u(ks[5], (hidden_size,), s_gc),
        "w_mlp":  u(ks[6], (hidden_size, latent_size), s_mlp),
        "b_mlp":  u(ks[7], (latent_size,), s_mlp),
        "w_mean": u(ks[8], (latent_size, latent_size), s_head),
        "b_mean": u(ks[9], (latent_size,), s_head),
        "w_var":  u(ks[10], (latent_size, latent_size), s_head),
        "b_var":  u(ks[11], (latent_size,), s_head),
    }


def reference_forward(x, p):
    """Pure-JAX f32 reference of the PyTorch forward (for correctness check)."""
    xp = jnp.transpose(x, (0, 2, 1))                               # (B, N, C)
    h = jnp.einsum("bnc,ch->bnh", xp, p["w1"])
    h = jnp.einsum("nm,bmh->bnh", p["att1"], h) + p["b1"]
    h = jax.nn.relu(h)
    h = jnp.einsum("bnh,hg->bng", h, p["w2"])
    h = jnp.einsum("nm,bmg->bng", p["att2"], h) + p["b2"]
    h = jax.nn.relu(h)
    s = jnp.sum(h, axis=1)
    xo = s @ p["w_mlp"] + p["b_mlp"]
    mu = xo @ p["w_mean"] + p["b_mean"]
    lv = xo @ p["w_var"] + p["b_var"]
    return xo, mu, lv


if __name__ == "__main__":
    num_nodes, input_size, hidden_size, latent_size = 8, 4, 32, 16

    key = jax.random.PRNGKey(0)
    k_x, k_x2, k_p = jax.random.split(key, 3)
    params = init_params(k_p, num_nodes, input_size, hidden_size, latent_size)
    prep = prepare_encoder_weights(params, num_nodes, input_size, hidden_size,
                                   latent_size)

    tol = dict(atol=5e-2, rtol=5e-2)   # bf16 MXU operands, f32 accumulation

    # Small batch (single grid step, blocks == full array dims).
    x = jax.random.normal(k_x, (2, input_size, num_nodes), dtype=jnp.float32)
    xo, mean, log_var = graph_encoder_forward(x, prep)
    jax.block_until_ready((xo, mean, log_var))
    xo_r, mean_r, lv_r = reference_forward(x, params)
    assert jnp.allclose(xo, xo_r, **tol), "latent mismatch (B=2)"
    assert jnp.allclose(mean, mean_r, **tol), "mean mismatch (B=2)"
    assert jnp.allclose(log_var, lv_r, **tol), "log_var mismatch (B=2)"

    # Larger batch: exercises the multi-grid-step path (2 steps of TB=24).
    x2 = jax.random.normal(k_x2, (48, input_size, num_nodes), dtype=jnp.float32)
    xo2, mean2, lv2 = graph_encoder_forward(x2, prep)
    jax.block_until_ready((xo2, mean2, lv2))
    xo2_r, mean2_r, lv2_r = reference_forward(x2, params)
    assert jnp.allclose(xo2, xo2_r, **tol), "latent mismatch (B=48)"
    assert jnp.allclose(mean2, mean2_r, **tol), "mean mismatch (B=48)"
    assert jnp.allclose(lv2, lv2_r, **tol), "log_var mismatch (B=48)"

    print("KERNEL_OK")
</pallas_src>

<mosaic_0001>
module attributes {stable_mosaic.version = 11 : i64} {
  func.func @graph_encoder_kernel(%arg0: i32, %arg1: memref<2x32xf32, #tpu.memory_space<vmem>>, %arg2: memref<32x256xbf16, #tpu.memory_space<vmem>>, %arg3: memref<1x256xf32, #tpu.memory_space<vmem>>, %arg4: memref<256x256xbf16, #tpu.memory_space<vmem>>, %arg5: memref<1x256xf32, #tpu.memory_space<vmem>>, %arg6: memref<256x128xbf16, #tpu.memory_space<vmem>>, %arg7: memref<1x128xf32, #tpu.memory_space<vmem>>, %arg8: memref<2x128xf32, #tpu.memory_space<vmem>>) attributes {dimension_semantics = [#tpu.dimension_semantics<parallel>], iteration_bounds = array<i64: 1>, scalar_prefetch = 0 : i64, scratch_operands = 0 : i64, tpu.core_type = #tpu.core_type<tc>, window_params = [{transform_indices = @transform_0, window_bounds = array<i64: 2, 32>}, {pipeline_mode = #tpu.pipeline_mode<synchronous>, transform_indices = @transform_1, window_bounds = array<i64: 32, 256>}, {pipeline_mode = #tpu.pipeline_mode<synchronous>, transform_indices = @transform_2, window_bounds = array<i64: 1, 256>}, {pipeline_mode = #tpu.pipeline_mode<synchronous>, transform_indices = @transform_3, window_bounds = array<i64: 256, 256>}, {pipeline_mode = #tpu.pipeline_mode<synchronous>, transform_indices = @transform_4, window_bounds = array<i64: 1, 256>}, {pipeline_mode = #tpu.pipeline_mode<synchronous>, transform_indices = @transform_5, window_bounds = array<i64: 256, 128>}, {pipeline_mode = #tpu.pipeline_mode<synchronous>, transform_indices = @transform_6, window_bounds = array<i64: 1, 128>}, {transform_indices = @transform_7, window_bounds = array<i64: 2, 128>}]} {
    %c0 = arith.constant 0 : index
    %c0_0 = arith.constant 0 : index
    %0 = vector.load %arg1[%c0, %c0_0] : memref<2x32xf32, #tpu.memory_space<vmem>>, vector<2x32xf32>
    %1 = arith.truncf %0 : vector<2x32xf32> to vector<2x32xbf16>
    %c0_1 = arith.constant 0 : index
    %c0_2 = arith.constant 0 : index
    %2 = vector.load %arg2[%c0_1, %c0_2] : memref<32x256xbf16, #tpu.memory_space<vmem>>, vector<32x256xbf16>
    %cst = arith.constant dense<0.000000e+00> : vector<2x256xf32>
    %3 = tpu.matmul %1, %2, %cst {dimension_numbers = #tpu.dot_dimension_numbers<[1], [0], [0], [1], [0, 0, 1, 1], [], []>} : vector<2x32xbf16>, vector<32x256xbf16>, vector<2x256xf32> -> vector<2x256xf32>
    %c0_3 = arith.constant 0 : index
    %c0_4 = arith.constant 0 : index
    %4 = vector.load %arg3[%c0_3, %c0_4] : memref<1x256xf32, #tpu.memory_space<vmem>>, vector<1x256xf32>
    %5 = vector.broadcast %4 : vector<1x256xf32> to vector<2x256xf32>
    %6 = arith.addf %3, %5 : vector<2x256xf32>
    %cst_5 = arith.constant 0.000000e+00 : f32
    %7 = vector.broadcast %cst_5 : f32 to vector<2x256xf32>
    %8 = arith.maximumf %6, %7 : vector<2x256xf32>
    %9 = arith.truncf %8 : vector<2x256xf32> to vector<2x256xbf16>
    %c0_6 = arith.constant 0 : index
    %c0_7 = arith.constant 0 : index
    %10 = vector.load %arg4[%c0_6, %c0_7] : memref<256x256xbf16, #tpu.memory_space<vmem>>, vector<256x256xbf16>
    %cst_8 = arith.constant dense<0.000000e+00> : vector<2x256xf32>
    %11 = tpu.matmul %9, %10, %cst_8 {dimension_numbers = #tpu.dot_dimension_numbers<[1], [0], [0], [1], [0, 0, 1, 1], [], []>} : vector<2x256xbf16>, vector<256x256xbf16>, vector<2x256xf32> -> vector<2x256xf32>
    %c0_9 = arith.constant 0 : index
    %c0_10 = arith.constant 0 : index
    %12 = vector.load %arg5[%c0_9, %c0_10] : memref<1x256xf32, #tpu.memory_space<vmem>>, vector<1x256xf32>
    %13 = vector.broadcast %12 : vector<1x256xf32> to vector<2x256xf32>
    %14 = arith.addf %11, %13 : vector<2x256xf32>
    %cst_11 = arith.constant 0.000000e+00 : f32
    %15 = vector.broadcast %cst_11 : f32 to vector<2x256xf32>
    %16 = arith.maximumf %14, %15 : vector<2x256xf32>
    %17 = arith.truncf %16 : vector<2x256xf32> to vector<2x256xbf16>
    %c0_12 = arith.constant 0 : index
    %c0_13 = arith.constant 0 : index
    %18 = vector.load %arg6[%c0_12, %c0_13] : memref<256x128xbf16, #tpu.memory_space<vmem>>, vector<256x128xbf16>
    %cst_14 = arith.constant dense<0.000000e+00> : vector<2x128xf32>
    %19 = tpu.matmul %17, %18, %cst_14 {dimension_numbers = #tpu.dot_dimension_numbers<[1], [0], [0], [1], [0, 0, 1, 1], [], []>} : vector<2x256xbf16>, vector<256x128xbf16>, vector<2x128xf32> -> vector<2x128xf32>
    %c0_15 = arith.constant 0 : index
    %c0_16 = arith.constant 0 : index
    %20 = vector.load %arg7[%c0_15, %c0_16] : memref<1x128xf32, #tpu.memory_space<vmem>>, vector<1x128xf32>
    %21 = vector.broadcast %20 : vector<1x128xf32> to vector<2x128xf32>
    %22 = arith.addf %19, %21 : vector<2x128xf32>
    %c0_17 = arith.constant 0 : index
    %c0_18 = arith.constant 0 : index
    %23 = vector.load %arg8[%c0_17, %c0_18] : memref<2x128xf32, #tpu.memory_space<vmem>>, vector<2x128xf32>
    tpu.vector_store %arg8[%c0_17, %c0_18], %22 {strides = array<i32>} : memref<2x128xf32, #tpu.memory_space<vmem>>, vector<2x128xf32>,
    return
  }
  func.func @transform_0(%arg0: i32) -> (i32, i32) {
    %c0_i32 = arith.constant 0 : i32
    %c0_i32_0 = arith.constant 0 : i32
    return %arg0, %c0_i32 : i32, i32
  }
  func.func @transform_1(%arg0: i32) -> (i32, i32) {
    %c0_i32 = arith.constant 0 : i32
    %c0_i32_0 = arith.constant 0 : i32
    %c0_i32_1 = arith.constant 0 : i32
    return %c0_i32, %c0_i32_0 : i32, i32
  }
  func.func @transform_2(%arg0: i32) -> (i32, i32) {
    %c0_i32 = arith.constant 0 : i32
    %c0_i32_0 = arith.constant 0 : i32
    %c0_i32_1 = arith.constant 0 : i32
    return %c0_i32, %c0_i32_0 : i32, i32
  }
  func.func @transform_3(%arg0: i32) -> (i32, i32) {
    %c0_i32 = arith.constant 0 : i32
    %c0_i32_0 = arith.constant 0 : i32
    %c0_i32_1 = arith.constant 0 : i32
    return %c0_i32, %c0_i32_0 : i32, i32
  }
  func.func @transform_4(%arg0: i32) -> (i32, i32) {
    %c0_i32 = arith.constant 0 : i32
    %c0_i32_0 = arith.constant 0 : i32
    %c0_i32_1 = arith.constant 0 : i32
    return %c0_i32, %c0_i32_0 : i32, i32
  }
  func.func @transform_5(%arg0: i32) -> (i32, i32) {
    %c0_i32 = arith.constant 0 : i32
    %c0_i32_0 = arith.constant 0 : i32
    %c0_i32_1 = arith.constant 0 : i32
    return %c0_i32, %c0_i32_0 : i32, i32
  }
  func.func @transform_6(%arg0: i32) -> (i32, i32) {
    %c0_i32 = arith.constant 0 : i32
    %c0_i32_0 = arith.constant 0 : i32
    %c0_i32_1 = arith.constant 0 : i32
    return %c0_i32, %c0_i32_0 : i32, i32
  }
  func.func @transform_7(%arg0: i32) -> (i32, i32) {
    %c0_i32 = arith.constant 0 : i32
    %c0_i32_0 = arith.constant 0 : i32
    return %arg0, %c0_i32 : i32, i32
  }
}

</mosaic_0001>

<bundles_post_ra>
// kernel: tpu_custom_call.1
= control target key start
LH: loop header
LB: loop body
LE: loop exit
PB: predicated region body
PF: predicated region fallthrough
CT: control target
= control target key end

     0   :  { %12 = vsyncpa [#allocation3], 0  ;;  %s1009_s0 = inlined_call_operand.hbm [shape: f32[2,32], index: 0, kind: input, shape index: {}]   ;;  %s1010_s1 = inlined_call_operand.hbm [shape: bf16[32,256], index: 1, kind: input, shape index: {}]   ;;  %s1011_s2 = inlined_call_operand.vmem [shape: f32[1,256], index: 2, kind: input, shape index: {}]   ;;  %s1012_s3 = inlined_call_operand.hbm [shape: bf16[256,256], index: 3, kind: input, shape index: {}]   ;;  %s1013_s4 = inlined_call_operand.vmem [shape: f32[1,256], index: 4, kind: input, shape index: {}]   ;;  %s1014_s5 = inlined_call_operand.hbm [shape: bf16[256,128], index: 5, kind: input, shape index: {}]   ;;  %s1015_s6 = inlined_call_operand.vmem [shape: f32[1,128], index: 6, kind: input, shape index: {}]   ;;  %s1016_s7 = inlined_call_operand.hbm [shape: f32[2,128], index: 7, kind: output, shape index: {}]  }
   0x1   :  { %13 = vsyncpa [#allocation6], 0 }
   0x2   :  { %14 = vsyncpa [#allocation9], 0 }
   0x3   :  { %15 = vsyncpa [#allocation4], 0  ;;  %s884_s24 = smov [#allocation5]   ;;  %s766_s28 = scalar_lea.hbm %s1010_s1, 512 }
   0x4   :  { %s31_s25 = sshll.u32 %s884_s24, 4  ;;  %p767_p0 = scmp.ne.s32.totalorder %s1010_s1, %s766_s28  ;;  %s32_s25 = int_to_ptr.vmem [resolvable:$true] %s31_s25 }
   0x5   :  { %p770_p1 = scmp.lt.u32.totalorder %s766_s28, %s1010_s1 }
   0x7   :  { %p772_p2 = pnand %p770_p1, %p767_p0 }
   0x9   :  { %775 = shalt.err (!%p772_p2)
}
   0xa   :  { %s776_s10 = scalar_lea.vmem %s32_s25, 512  ;;  %p781_p4 = scmp.lt.s32.totalorder %s32_s25, %s32_s25 }
   0xb   :  { %p777_p3 = scmp.ne.s32.totalorder %s32_s25, %s776_s10  ;;  %p782_p5 = scmp.lt.s32.totalorder %s776_s10, %s776_s10 }
   0xd   :  { %p783_p6 = por %p782_p5, %p781_p4 }
   0xf   :  { %p784_p7 = pnand %p783_p6, %p777_p3 }
  0x11   :  { %787 = shalt.err (!%p784_p7)
}
  0x12   :  { %s885_s11 = smov 128   ;;  %s886_s12 = smov 8  }
  0x13   :  { %37 = dma.hbm_to_vmem [thread:$0]  %s1010_s1, 512, %s32_s25, [#allocation6], %s885_s11, %s885_s11, %s886_s12  }
  0x14   :  { %s887_s15 = smov [#allocation2]   ;;  %s888_s17 = smov [#allocation7]  }
  0x15   :  { %s22_s16 = sshll.u32 %s887_s15, 4  ;;  %s45_s18 = sshll.u32 %s888_s17, 4  ;;  %s23_s16 = int_to_ptr.vmem [resolvable:$true] %s22_s16  ;;  %s46_s18 = int_to_ptr.vmem [resolvable:$true] %s45_s18 }
  0x16   :  { %s788_s21 = scalar_lea.hbm %s1009_s0, 32 }
  0x17   :  { %p789_p8 = scmp.ne.s32.totalorder %s1009_s0, %s788_s21  ;;  %p792_p9 = scmp.lt.u32.totalorder %s788_s21, %s1009_s0 }
  0x19   :  { %p794_p10 = pnand %p792_p9, %p789_p8 }
  0x1b   :  { %797 = shalt.err (!%p794_p10)
}
  0x1c   :  { %s798_s1 = scalar_lea.vmem %s23_s16, 32  ;;  %p803_p12 = scmp.lt.s32.totalorder %s23_s16, %s23_s16 }
  0x1d   :  { %p799_p11 = scmp.ne.s32.totalorder %s23_s16, %s798_s1  ;;  %p804_p13 = scmp.lt.s32.totalorder %s798_s1, %s798_s1 }
  0x1f   :  { %p805_p0 = por %p804_p13, %p803_p12 }
  0x21   :  { %p806_p1 = pnand %p805_p0, %p799_p11 }
  0x23   :  { %809 = shalt.err (!%p806_p1)
}
  0x24   :  { %25 = dma.hbm_to_vmem [thread:$0]  %s1009_s0, 32, %s23_s16, [#allocation3]  }
  0x25   :  { %s810_s30 = scalar_lea.hbm %s1012_s3, 4096 }
  0x26   :  { %p811_p2 = scmp.ne.s32.totalorder %s1012_s3, %s810_s30  ;;  %p814_p3 = scmp.lt.u32.totalorder %s810_s30, %s1012_s3 }
  0x28   :  { %p816_p4 = pnand %p814_p3, %p811_p2 }
  0x2a   :  { %819 = shalt.err (!%p816_p4)
}
  0x2b   :  { %s820_s14 = scalar_lea.vmem %s46_s18, 4096  ;;  %p825_p6 = scmp.lt.s32.totalorder %s46_s18, %s46_s18 }
  0x2c   :  { %p821_p5 = scmp.ne.s32.totalorder %s46_s18, %s820_s14  ;;  %p826_p7 = scmp.lt.s32.totalorder %s820_s14, %s820_s14 }
  0x2e   :  { %p827_p8 = por %p826_p7, %p825_p6 }
  0x30   :  { %p828_p9 = pnand %p827_p8, %p821_p5 }
  0x32   :  { %831 = shalt.err (!%p828_p9)
}
  0x33   :  { %51 = dma.hbm_to_vmem [thread:$0]  %s1012_s3, 4096, %s46_s18, [#allocation6], %s885_s11, %s885_s11, %s886_s12  }
  0x34   :  { %s889_s16 = smov [#allocation8]   ;;  %s832_s21 = scalar_lea.hbm %s1014_s5, 2048 }
  0x35   :  { %s59_s17 = sshll.u32 %s889_s16, 4  ;;  %p833_p10 = scmp.ne.s32.totalorder %s1014_s5, %s832_s21  ;;  %s60_s17 = int_to_ptr.vmem [resolvable:$true] %s59_s17 }
  0x36   :  { %p836_p11 = scmp.lt.u32.totalorder %s832_s21, %s1014_s5 }
  0x38   :  { %p838_p12 = pnand %p836_p11, %p833_p10 }
  0x3a   :  { %841 = shalt.err (!%p838_p12)
}
  0x3b   :  { %s842_s1 = scalar_lea.vmem %s60_s17, 2048  ;;  %p847_p0 = scmp.lt.s32.totalorder %s60_s17, %s60_s17 }
  0x3c   :  { %p843_p13 = scmp.ne.s32.totalorder %s60_s17, %s842_s1  ;;  %p848_p1 = scmp.lt.s32.totalorder %s842_s1, %s842_s1 }
  0x3e   :  { %p849_p2 = por %p848_p1, %p847_p0 }
  0x40   :  { %p850_p3 = pnand %p849_p2, %p843_p13 }
  0x42   :  { %853 = shalt.err (!%p850_p3)
}
  0x43   :  { %s890_s3 = smov 64   ;;  %s891_s11 = smov 4  }
  0x44   :  { %65 = dma.hbm_to_vmem [thread:$0]  %s1014_s5, 2048, %s60_s17, [#allocation9], %s890_s3, %s890_s3, %s891_s11  }
  0x45   :  { %876 = dma.done.wait [#allocation3], 32  }
  0x46   :  { %877 = vsyncadd [#allocation3], 4294967264 }
  0x47   :  { %878 = dma.done.wait [#allocation6], 4608  }
  0x48   :  { %879 = vsyncadd [#allocation6], 4294962688 }
  0x49   :  { %880 = dma.done.wait [#allocation9], 2048  }
  0x4a   :  { %881 = vsyncadd [#allocation9], 4294965248  ;;  %v892_v0 = vmov 0   ;;  %v696_v1 = vld [vmem:[#allocation5 + $0x4] ss:$8 sps:$4 sm:$0xff]   ;;  %vm119_vm0 = vcmask 261120   ;;  %v89_v51 = vlaneseq }
  0x4b   :  { %155 = vmatprep.mubr.bf16.mxu0 %v892_v0  ;;  %v698_v2 = vld [vmem:[#allocation5] ss:$8 sps:$4 sm:$0xff]   ;;  %123 = vmatprep.subr.bf16.mxu0 %v696_v1  ;;  %v699_v3 = vld [vmem:[#allocation5 + $0x14] ss:$8 sps:$4 sm:$0xff]   ;;  %v701_v4 = vld [vmem:[#allocation5 + $0x10] ss:$8 sps:$4 sm:$0xff]  }
  0x4c   :  { %v81_v5 = vld [vmem:[#allocation2] sm:$0x3]  ;;  %124 = vmatpush1.bf16.msra.mxu0 %v698_v2  ;;  %v702_v6 = vld [vmem:[#allocation7 + $0x4] ss:$8 sps:$4 sm:$0xff]   ;;  %v704_v7 = vld [vmem:[#allocation7] ss:$8 sps:$4 sm:$0xff]  }
  0x4d   :  { %125 = vmatprep.subr.bf16.mxu0 %v699_v3  ;;  %372 = vmatprep.subr.bf16.mxu1 %v702_v6  ;;  %v705_v8 = vld [vmem:[#allocation7 + $0x14] ss:$8 sps:$4 sm:$0xff]   ;;  %v82_v9 = vpack.c.bf16 %v81_v5, %v81_v5  ;;  %v707_v10 = vld [vmem:[#allocation7 + $0x10] ss:$8 sps:$4 sm:$0xff]   ;;  %v708_v11 = vld [vmem:[#allocation7 + $0x24] ss:$8 sps:$4 sm:$0xff]  }
  0x4e   :  { %373 = vmatpush1.bf16.msra.mxu1 %v704_v7  ;;  %v710_v12 = vld [vmem:[#allocation7 + $0x20] ss:$8 sps:$4 sm:$0xff]   ;;  %v711_v13 = vld [vmem:[#allocation7 + $0x34] ss:$8 sps:$4 sm:$0xff]   ;;  %v713_v14 = vld [vmem:[#allocation7 + $0x30] ss:$8 sps:$4 sm:$0xff]  }
  0x4f   :  { %374 = vmatprep.subr.bf16.mxu1 %v705_v8  ;;  %v714_v15 = vld [vmem:[#allocation7 + $0x44] ss:$8 sps:$4 sm:$0xff]   ;;  %v716_v16 = vld [vmem:[#allocation7 + $0x40] ss:$8 sps:$4 sm:$0xff]   ;;  %v717_v17 = vld [vmem:[#allocation7 + $0x54] ss:$8 sps:$4 sm:$0xff]  }
  0x50   :  { %126 = vmatpush1.bf16.msra.mxu0 %v701_v4  ;;  %v719_v18 = vld [vmem:[#allocation7 + $0x50] ss:$8 sps:$4 sm:$0xff]   ;;  %v720_v19 = vld [vmem:[#allocation7 + $0x64] ss:$8 sps:$4 sm:$0xff]   ;;  %v722_v20 = vld [vmem:[#allocation7 + $0x60] ss:$8 sps:$4 sm:$0xff]  }
  0x51   :  { %v723_v21 = vld [vmem:[#allocation7 + $0x74] ss:$8 sps:$4 sm:$0xff]   ;;  %v725_v22 = vld [vmem:[#allocation7 + $0x70] ss:$8 sps:$4 sm:$0xff]   ;;  %v726_v23 = vld [vmem:[#allocation7 + $0x84] ss:$8 sps:$4 sm:$0xff]  }
  0x52   :  { %375 = vmatpush1.bf16.msra.mxu1 %v707_v10  ;;  %v728_v24 = vld [vmem:[#allocation7 + $0x80] ss:$8 sps:$4 sm:$0xff]   ;;  %v729_v25 = vld [vmem:[#allocation7 + $0x94] ss:$8 sps:$4 sm:$0xff]   ;;  %v731_v26 = vld [vmem:[#allocation7 + $0x90] ss:$8 sps:$4 sm:$0xff]  }
  0x53   :  { %614 = vmatmul.mubr.msk.bf16.vlgmr.msra.gmra.mrb[0].mxu0 %vm119_vm0, %v82_v9  ;;  %376 = vmatprep.subr.bf16.mxu1 %v708_v11  ;;  %v732_v27 = vld [vmem:[#allocation7 + $0xa4] ss:$8 sps:$4 sm:$0xff]   ;;  %v734_v28 = vld [vmem:[#allocation7 + $0xa0] ss:$8 sps:$4 sm:$0xff]   ;;  %v735_v29 = vld [vmem:[#allocation7 + $0xb4] ss:$8 sps:$4 sm:$0xff]  }
  0x54   :  { %v737_v30 = vld [vmem:[#allocation7 + $0xb0] ss:$8 sps:$4 sm:$0xff]   ;;  %v738_v31 = vld [vmem:[#allocation7 + $0xc4] ss:$8 sps:$4 sm:$0xff]   ;;  %v740_v32 = vld [vmem:[#allocation7 + $0xc0] ss:$8 sps:$4 sm:$0xff]  }
  0x55   :  { %v741_v33 = vld [vmem:[#allocation7 + $0xd4] ss:$8 sps:$4 sm:$0xff]   ;;  %v743_v34 = vld [vmem:[#allocation7 + $0xd0] ss:$8 sps:$4 sm:$0xff]   ;;  %v744_v35 = vld [vmem:[#allocation7 + $0xe4] ss:$8 sps:$4 sm:$0xff]  }
  0x56   :  { %377 = vmatpush1.bf16.msra.mxu1 %v710_v12  ;;  %v746_v36 = vld [vmem:[#allocation7 + $0xe0] ss:$8 sps:$4 sm:$0xff]   ;;  %v747_v37 = vld [vmem:[#allocation7 + $0xf4] ss:$8 sps:$4 sm:$0xff]   ;;  %v749_v38 = vld [vmem:[#allocation7 + $0xf0] ss:$8 sps:$4 sm:$0xff]  }
  0x57   :  { %378 = vmatprep.subr.bf16.mxu1 %v711_v13  ;;  %v750_v39 = vld [vmem:[#allocation8 + $0x40] sm:$0xff]   ;;  %v752_v41 = vld [vmem:[#allocation8 + $0x48] sm:$0xff]   ;;  %v754_v43 = vld [vmem:[#allocation8 + $0x50] sm:$0xff]   ;;  %v90_v52 = vshrl.u32 %v89_v51, 7 }
  0x58   :  { %v751_v40 = vld [vmem:[#allocation8] sm:$0xff]   ;;  %664 = vmatprep.subr.bf16.mxu0 %v750_v39  ;;  %v753_v42 = vld [vmem:[#allocation8 + $0x8] sm:$0xff]   ;;  %v755_v44 = vld [vmem:[#allocation8 + $0x10] sm:$0xff]  }
  0x59   :  { %665 = vmatpush3.bf16.msra.mxu0 %v751_v40  ;;  %v756_v45 = vld [vmem:[#allocation8 + $0x58] sm:$0xff]   ;;  %v758_v47 = vld [vmem:[#allocation8 + $0x60] sm:$0xff]   ;;  %v760_v49 = vld [vmem:[#allocation8 + $0x68] sm:$0xff]   ;;  %v91_v53 = vsub.s32 0, %v90_v52  ;;  %v95_v55 = vsub.s32 1, %v90_v52 }
  0x5a   :  { %379 = vmatpush1.bf16.msra.mxu1 %v713_v14  ;;  %666 = vmatprep.subr.bf16.mxu0 %v752_v41  ;;  %v757_v46 = vld [vmem:[#allocation8 + $0x18] sm:$0xff]   ;;  %v759_v48 = vld [vmem:[#allocation8 + $0x20] sm:$0xff]   ;;  %v761_v50 = vld [vmem:[#allocation8 + $0x28] sm:$0xff]  }
  0x5b   :  { %380 = vmatprep.subr.bf16.mxu1 %v714_v15  ;;  %v87_v54 = vld [vmem:[%s1011_s2] sm:$0x3]  ;;  %v762_v4 = vld [vmem:[#allocation8 + $0x70] sm:$0xff]  }
  0x5c   :  { %v92_v56 = vrot.slane %v87_v54, %v91_v53  ;;  %v96_v57 = vrot.slane %v87_v54, %v95_v55  ;;  %v763_v5 = vld [vmem:[#allocation8 + $0x30] sm:$0xff]   ;;  %v764_v6 = vld [vmem:[#allocation8 + $0x78] sm:$0xff]  }
  0x5d   :  { %667 = vmatpush3.bf16.msra.mxu0 %v753_v42  ;;  %v765_v7 = vld [vmem:[#allocation8 + $0x38] sm:$0xff]  }
  0x5e   :  { %381 = vmatpush1.bf16.msra.mxu1 %v716_v16  ;;  %668 = vmatprep.subr.bf16.mxu0 %v754_v43  ;;  %v200_v8 = vld [vmem:[%s1013_s4] sm:$0x3]  ;;  %s893_s4 = smov [#allocation10]  }
  0x5f   :  { %382 = vmatprep.subr.bf16.mxu1 %v717_v17  ;;  %v205_v9 = vrot.slane %v200_v8, %v91_v53  ;;  %v209_v10 = vrot.slane %v200_v8, %v95_v55  ;;  %s599_s30 = sshll.u32 %s893_s4, 4  ;;  %s600_s30 = int_to_ptr.vmem [resolvable:$true] %s599_s30 }
  0x60   :  { %s854_s8 = scalar_lea.vmem %s600_s30, 32  ;;  %p859_p5 = scmp.lt.s32.totalorder %s600_s30, %s600_s30 }
  0x61   :  { %669 = vmatpush3.bf16.msra.mxu0 %v755_v44  ;;  %p855_p4 = scmp.ne.s32.totalorder %s600_s30, %s854_s8  ;;  %p860_p6 = scmp.lt.s32.totalorder %s854_s8, %s854_s8 }
  0x62   :  { %383 = vmatpush1.bf16.msra.mxu1 %v719_v18  ;;  %670 = vmatprep.subr.bf16.mxu0 %v756_v45 }
  0x63   :  { %384 = vmatprep.subr.bf16.mxu1 %v720_v19  ;;  %p861_p7 = por %p860_p6, %p859_p5 }
  0x65   :  { %671 = vmatpush3.bf16.msra.mxu0 %v757_v46  ;;  %p862_p8 = pnand %p861_p7, %p855_p4 }
  0x66   :  { %385 = vmatpush1.bf16.msra.mxu1 %v722_v20  ;;  %672 = vmatprep.subr.bf16.mxu0 %v758_v47 }
  0x67   :  { %386 = vmatprep.subr.bf16.mxu1 %v723_v21 }
  0x69   :  { %673 = vmatpush3.bf16.msra.mxu0 %v759_v48 }
  0x6a   :  { %387 = vmatpush1.bf16.msra.mxu1 %v725_v22  ;;  %674 = vmatprep.subr.bf16.mxu0 %v760_v49  ;;  %v647_v22 = vld [vmem:[%s1015_s6] ss:$0 sm:$0xff] }
  0x6b   :  { %388 = vmatprep.subr.bf16.mxu1 %v726_v23 }
  0x6d   :  { %675 = vmatpush3.bf16.msra.mxu0 %v761_v50 }
  0x6e   :  { %389 = vmatpush1.bf16.msra.mxu1 %v728_v24  ;;  %676 = vmatprep.subr.bf16.mxu0 %v762_v4 }
  0x6f   :  { %390 = vmatprep.subr.bf16.mxu1 %v729_v25 }
  0x71   :  { %677 = vmatpush3.bf16.msra.mxu0 %v763_v5 }
  0x72   :  { %391 = vmatpush1.bf16.msra.mxu1 %v731_v26  ;;  %678 = vmatprep.subr.bf16.mxu0 %v764_v6 }
  0x73   :  { %392 = vmatprep.subr.bf16.mxu1 %v732_v27 }
  0x75   :  { %679 = vmatpush3.bf16.msra.mxu0 %v765_v7 }
  0x76   :  { %393 = vmatpush1.bf16.msra.mxu1 %v734_v28 }
  0x77   :  { %394 = vmatprep.subr.bf16.mxu1 %v735_v29 }
  0x7a   :  { %395 = vmatpush1.bf16.msra.mxu1 %v737_v30 }
  0x7b   :  { %396 = vmatprep.subr.bf16.mxu1 %v738_v31 }
  0x7e   :  { %397 = vmatpush1.bf16.msra.mxu1 %v740_v32 }
  0x7f   :  { %398 = vmatprep.subr.bf16.mxu1 %v741_v33 }
  0x82   :  { %399 = vmatpush1.bf16.msra.mxu1 %v743_v34 }
  0x83   :  { %400 = vmatprep.subr.bf16.mxu1 %v744_v35 }
  0x86   :  { %401 = vmatpush1.bf16.msra.mxu1 %v746_v36 }
  0x87   :  { %402 = vmatprep.subr.bf16.mxu1 %v747_v37 }
  0x8a   :  { %403 = vmatpush1.bf16.msra.mxu1 %v749_v38 }
 0x126   :  { %v157_v58 = vpop.f32.mrb[0].mxu0 }
 0x127   :  { %v158_v59 = vadd.f32 %v157_v58, %v92_v56  ;;  %v159_v60 = vpop.f32.mrb[1].mxu0 }
 0x128   :  { %v160_v61 = vadd.f32 %v159_v60, %v96_v57  ;;  %v161_v62 = vpop.f32.mrb[2].mxu0 }
 0x129   :  { %v164_v63 = vmax.f32 %v158_v59, 0.0  ;;  %v162_v0 = vpop.f32.mrb[3].mxu0 }
 0x12a   :  { %v165_v1 = vmax.f32 %v160_v61, 0.0 }
 0x12b   :  { %v166_v3 = vpack.c.bf16 %v164_v63, %v164_v63 }
 0x12c   :  { %v167_v2 = vpack.c.bf16 %v165_v1, %v165_v1 }
 0x12e   :  { %404 = vmatprep.mubr.bf16.mxu1 %v167_v2 }
 0x12f   :  { %405 = vmatmul.mubr.bf16.vlgmr.msra.gmra.mrb[0].mxu1 %v166_v3 }
 0x202   :  { %v406_v11 = vpop.f32.mrb[0].mxu1 }
 0x203   :  { %v407_v12 = vadd.f32 %v406_v11, %v205_v9  ;;  %v408_v13 = vpop.f32.mrb[1].mxu1 }
 0x204   :  { %v409_v14 = vadd.f32 %v408_v13, %v209_v10  ;;  %v410_v15 = vpop.f32.mrb[2].mxu1 }
 0x205   :  { %v413_v16 = vmax.f32 %v407_v12, 0.0  ;;  %v411_v17 = vpop.f32.mrb[3].mxu1 }
 0x206   :  { %v414_v18 = vmax.f32 %v409_v14, 0.0 }
 0x207   :  { %v415_v20 = vpack.c.bf16 %v413_v16, %v413_v16 }
 0x208   :  { %v416_v19 = vpack.c.bf16 %v414_v18, %v414_v18 }
 0x20a   :  { %584 = vmatprep.mubr.bf16.mxu0 %v416_v19 }
 0x20b   :  { %585 = vmatmul.mubr.bf16.vlgmr.msra.gmra.mrb[4].mxu0 %v415_v20 }
 0x2de   :  { %v680_v21 = vpop.f32.mrb[4].mxu0 }
 0x2df   :  { %v681_v23 = vpop.f32.mrb[5].mxu0 }
 0x2e0   :  { %v682_v24 = vadd.f32 %v681_v23, %v680_v21  ;;  %v683_v25 = vpop.f32.mrb[6].mxu0 }
 0x2e1   :  { %v684_v26 = vpop.f32.mrb[7].mxu0 }
 0x2e2   :  { %v587_v27 = vadd.f32 %v682_v24, %v647_v22 }
 0x2e4   :  { %592 = vst [vmem:[#allocation10] sm:$0x3] %v587_v27 }
 0x2e5   :  { %865 = shalt.err (!%p862_p8)
}
 0x2e6   :  { %s866_s6 = scalar_lea.hbm %s1016_s7, 32 }
 0x2e7   :  { %p867_p9 = scmp.ne.s32.totalorder %s1016_s7, %s866_s6  ;;  %p870_p10 = scmp.lt.u32.totalorder %s866_s6, %s1016_s7 }
 0x2e9   :  { %p872_p11 = pnand %p870_p10, %p867_p9 }
 0x2eb   :  { %875 = shalt.err (!%p872_p11)
}
 0x2ec   :  { %602 = dma.vmem_to_hbm [thread:$0]  %s600_s30, 32, %s1016_s7, [#allocation4]  }
 0x2ed   :  { %882 = dma.done.wait [#allocation4], 32  }
 0x2ee   :  { %883 = vsyncadd [#allocation4], 4294967264 }
 0x2ef   :  { %606 = vsyncpa [#allocation3], 1 }
 0x2f0   :  { %607 = vsyncpa [#allocation6], 1 }
 0x2f1   :  { %608 = vsyncpa [#allocation9], 1 }
 0x2f2   :  { %609 = vsyncpa [#allocation4], 1 }

</bundles_post_ra>
